<compile_context>
chip_gen: v7x
topology: tpu7x:2x2x1
jax: 0.10.0
libtpu: 0.0.40
codegen_flags: <defaults>
</compile_context>

<pallas_src>
import functools

import jax
import jax.numpy as jnp
from jax.experimental import pallas as pl
from jax.experimental.pallas import tpu as pltpu


def _round_up(x, m):
    return ((x + m - 1) // m) * m


# ---------------------------------------------------------------------------
# Fused encoder kernel: one grid step = one (TM, K) row-tile of one element
# type (nodes / edges / glob).  The scalar-prefetch `type_ids` table drives the
# weight/bias index_maps, so the correct [K, N] weight block is resident in
# VMEM for each tile; weights for all three encoders never leave VMEM between
# tiles of the same type.
# ---------------------------------------------------------------------------
def _fused_encoder_kernel(type_ids_ref, x_ref, w_ref, b_ref, o_ref, *, compute_dtype):
    del type_ids_ref  # only used by the index_maps
    # x: (TM, K), w: (1, K, N), b: (1, 1, N) -> o: (TM, N)
    x = x_ref[...].astype(compute_dtype)
    w = w_ref[0].astype(compute_dtype)
    acc = jnp.dot(x, w, preferred_element_type=jnp.float32)   # MXU, f32 accumulate
    o_ref[...] = (acc + b_ref[0]).astype(o_ref.dtype)          # bias add in f32 (VPU)


def fused_graph_encoder(nodes, edges, glob, w_stack, b_stack, *,
                        block_m=512,
                        compute_dtype=jnp.bfloat16,
                        vmem_limit_bytes=48 * 1024 * 1024):
    """Apply per-element-type Linear encoders in a single pallas_call.

    nodes:  [Mn, K]   edges: [Me, K]   glob: [Mg, K]
    w_stack: [3, K, N] (order: nodes, edges, glob), b_stack: [3, N]
    Returns (nodes_out, edges_out, glob_out) with feature dim N.
    """
    segments = (nodes, edges, glob)
    k = nodes.shape[1]
    assert all(s.shape[1] == k for s in segments)
    n_types, k_w, n = w_stack.shape
    assert n_types == 3 and k_w == k
    b_stack = b_stack.reshape(3, 1, n)

    # Row-tile size: multiple of 8 sublanes; capped for v7x's smaller VMEM
    # (block_m=512 keeps 2x double-buffered (TM,K)+(TM,N) tiles tiny vs 64 MiB).
    max_rows = max(s.shape[0] for s in segments)
    tm = min(block_m, _round_up(max_rows, 8))

    # Pad each segment to a whole number of row tiles and concatenate so the
    # whole block runs as ONE launch instead of three.
    padded, type_ids, seg_tiles = [], [], []
    for t, s in enumerate(segments):
        n_tiles = max(1, -(-s.shape[0] // tm))
        pad = n_tiles * tm - s.shape[0]
        padded.append(jnp.pad(s, ((0, pad), (0, 0))) if pad else s)
        type_ids.extend([t] * n_tiles)
        seg_tiles.append(n_tiles)
    x = jnp.concatenate(padded, axis=0)
    num_tiles = sum(seg_tiles)
    type_ids = jnp.asarray(type_ids, dtype=jnp.int32)

    m_total = x.shape[0]
    itemsize = x.dtype.itemsize
    cost = pl.CostEstimate(
        flops=2 * m_total * k * n,
        transcendentals=0,
        bytes_accessed=(x.size + w_stack.size + b_stack.size) * itemsize
                       + m_total * n * itemsize,
    )

    kernel = functools.partial(_fused_encoder_kernel, compute_dtype=compute_dtype)

    out = pl.pallas_call(
        kernel,
        out_shape=jax.ShapeDtypeStruct((m_total, n), nodes.dtype),
        grid_spec=pltpu.PrefetchScalarGridSpec(
            num_scalar_prefetch=1,
            grid=(num_tiles,),
            in_specs=[
                # streamed row tiles of the packed inputs
                pl.BlockSpec((tm, k), lambda i, t: (i, 0)),
                # per-type weight / bias block selected via scalar prefetch
                pl.BlockSpec((1, k, n), lambda i, t: (t[i], 0, 0)),
                pl.BlockSpec((1, 1, n), lambda i, t: (t[i], 0, 0)),
            ],
            out_specs=pl.BlockSpec((tm, n), lambda i, t: (i, 0)),
        ),
        compiler_params=pltpu.CompilerParams(
            dimension_semantics=("parallel",),   # v7x: 2 TCs shard the row tiles
            vmem_limit_bytes=vmem_limit_bytes,
        ),
        cost_estimate=cost,
    )(type_ids, x, w_stack, b_stack)

    # Un-pack / un-pad the three segments.
    offs, acc = [], 0
    for n_tiles in seg_tiles:
        offs.append(acc)
        acc += n_tiles * tm
    nodes_out = out[offs[0]:offs[0] + nodes.shape[0]]
    edges_out = out[offs[1]:offs[1] + edges.shape[0]]
    glob_out = out[offs[2]:offs[2] + glob.shape[0]]
    return nodes_out, edges_out, glob_out


# ---------------------------------------------------------------------------
# GraphIndependent (JAX mirror of the PyTorch module)
# ---------------------------------------------------------------------------
class GraphIndependent:
    """Applies models to nodes/edges/global independently (identity default).

    The identity default does ZERO device work (returns the input unchanged);
    there is no HBM->VMEM->HBM copy kernel.
    """

    def __init__(self, edge_model_fn=None, node_model_fn=None, global_model_fn=None):
        self.edge_model_fn = edge_model_fn if edge_model_fn is not None else (lambda x: x)
        self.node_model_fn = node_model_fn if node_model_fn is not None else (lambda x: x)
        self.global_model_fn = global_model_fn if global_model_fn is not None else (lambda x: x)

    def __call__(self, nodes=None, edges=None, glob=None):
        nodes_out = self.node_model_fn(nodes)
        edges_out = self.edge_model_fn(edges)
        global_out = self.global_model_fn(glob)
        return (nodes_out, edges_out, global_out)


class FusedLinearGraphIndependent:
    """GraphIndependent where all three model_fns are Linear encoders, fused
    into a single Pallas launch (same outputs as three nn.Linear applications)."""

    def __init__(self, w_stack, b_stack, **kwargs):
        self.w_stack = w_stack
        self.b_stack = b_stack
        self.kwargs = kwargs

    def __call__(self, nodes=None, edges=None, glob=None):
        return fused_graph_encoder(nodes, edges, glob, self.w_stack, self.b_stack,
                                   **self.kwargs)


if __name__ == "__main__":
    key = jax.random.PRNGKey(0)
    k_n, k_e, k_g, k_w, k_b = jax.random.split(key, 5)

    # Small shapes; hidden is a multiple of 128 so the output is lane-dense.
    num_nodes, num_edges, feat, hidden = 8, 12, 16, 128
    nodes = jax.random.normal(k_n, (num_nodes, feat), jnp.float32)
    edges = jax.random.normal(k_e, (num_edges, feat), jnp.float32)
    glob = jax.random.normal(k_g, (1, feat), jnp.float32)

    # --- default GraphIndependent: identity, no device work at all
    gi_default = GraphIndependent()
    n0, e0, g0 = gi_default(nodes=nodes, edges=edges, glob=glob)
    assert n0 is nodes and e0 is edges and g0 is glob

    # --- GraphIndependent with Linear encoders: one fused Pallas launch
    bound = 1.0 / jnp.sqrt(feat)
    w_stack = jax.random.uniform(k_w, (3, feat, hidden), jnp.float32, -bound, bound)
    b_stack = jax.random.uniform(k_b, (3, hidden), jnp.float32, -bound, bound)

    gi_enc = FusedLinearGraphIndependent(w_stack, b_stack)
    n1, e1, g1 = jax.block_until_ready(gi_enc(nodes=nodes, edges=edges, glob=glob))

    # Reference matching the kernel's bf16-input / f32-accumulate math.
    def ref_linear(x, w, b):
        return jnp.dot(x.astype(jnp.bfloat16), w.astype(jnp.bfloat16),
                       preferred_element_type=jnp.float32) + b

    assert jnp.allclose(n1, ref_linear(nodes, w_stack[0], b_stack[0]), atol=1e-3, rtol=1e-3)
    assert jnp.allclose(e1, ref_linear(edges, w_stack[1], b_stack[1]), atol=1e-3, rtol=1e-3)
    assert jnp.allclose(g1, ref_linear(glob, w_stack[2], b_stack[2]), atol=1e-3, rtol=1e-3)

    # Looser sanity check against the pure-f32 reference (bf16 rounding only).
    assert jnp.allclose(n1, nodes @ w_stack[0] + b_stack[0], atol=5e-2)
    assert jnp.allclose(e1, edges @ w_stack[1] + b_stack[1], atol=5e-2)
    assert jnp.allclose(g1, glob @ w_stack[2] + b_stack[2], atol=5e-2)

    assert n1.shape == (num_nodes, hidden)
    assert e1.shape == (num_edges, hidden)
    assert g1.shape == (1, hidden)

    print("KERNEL_OK")
</pallas_src>

<mosaic_0001>
module attributes {stable_mosaic.version = 11 : i64} {
  func.func @_fused_encoder_kernel(%arg0: i32, %arg1: memref<3xi32, #tpu.memory_space<smem>>, %arg2: memref<16x16xf32, #tpu.memory_space<vmem>>, %arg3: memref<1x16x128xf32, #tpu.memory_space<vmem>>, %arg4: memref<1x1x128xf32, #tpu.memory_space<vmem>>, %arg5: memref<16x128xf32, #tpu.memory_space<vmem>>) attributes {dimension_semantics = [#tpu.dimension_semantics<parallel>], iteration_bounds = array<i64: 3>, scalar_prefetch = 1 : i64, scratch_operands = 0 : i64, tpu.core_type = #tpu.core_type<tc>, window_params = [{transform_indices = @transform_0, window_bounds = array<i64: 16, 16>}, {transform_indices = @transform_1, window_bounds = array<i64: 1, 16, 128>}, {transform_indices = @transform_2, window_bounds = array<i64: 1, 1, 128>}, {transform_indices = @transform_3, window_bounds = array<i64: 16, 128>}]} {
    %c0 = arith.constant 0 : index
    %c0_0 = arith.constant 0 : index
    %0 = vector.load %arg2[%c0, %c0_0] : memref<16x16xf32, #tpu.memory_space<vmem>>, vector<16x16xf32>
    %1 = arith.truncf %0 : vector<16x16xf32> to vector<16x16xbf16>
    %c0_1 = arith.constant 0 : index
    %c0_2 = arith.constant 0 : index
    %c0_3 = arith.constant 0 : index
    %2 = vector.load %arg3[%c0_1, %c0_2, %c0_3] : memref<1x16x128xf32, #tpu.memory_space<vmem>>, vector<1x16x128xf32>
    %3 = vector.shape_cast %2 : vector<1x16x128xf32> to vector<16x128xf32>
    %4 = arith.truncf %3 : vector<16x128xf32> to vector<16x128xbf16>
    %cst = arith.constant dense<0.000000e+00> : vector<16x128xf32>
    %5 = tpu.matmul %1, %4, %cst {dimension_numbers = #tpu.dot_dimension_numbers<[1], [0], [0], [1], [0, 0, 1, 1], [], []>} : vector<16x16xbf16>, vector<16x128xbf16>, vector<16x128xf32> -> vector<16x128xf32>
    %c0_4 = arith.constant 0 : index
    %c0_5 = arith.constant 0 : index
    %c0_6 = arith.constant 0 : index
    %6 = vector.load %arg4[%c0_4, %c0_5, %c0_6] : memref<1x1x128xf32, #tpu.memory_space<vmem>>, vector<1x1x128xf32>
    %7 = vector.shape_cast %6 : vector<1x1x128xf32> to vector<1x128xf32>
    %8 = vector.broadcast %7 : vector<1x128xf32> to vector<16x128xf32>
    %9 = arith.addf %5, %8 : vector<16x128xf32>
    %c0_7 = arith.constant 0 : index
    %c0_8 = arith.constant 0 : index
    %10 = vector.load %arg5[%c0_7, %c0_8] : memref<16x128xf32, #tpu.memory_space<vmem>>, vector<16x128xf32>
    tpu.vector_store %arg5[%c0_7, %c0_8], %9 {strides = array<i32>} : memref<16x128xf32, #tpu.memory_space<vmem>>, vector<16x128xf32>,
    return
  }
  func.func @transform_0(%arg0: i32, %arg1: memref<3xi32, #tpu.memory_space<smem>>) -> (i32, i32) {
    %c0_i32 = arith.constant 0 : i32
    %c0_i32_0 = arith.constant 0 : i32
    return %arg0, %c0_i32 : i32, i32
  }
  func.func @transform_1(%arg0: i32, %arg1: memref<3xi32, #tpu.memory_space<smem>>) -> (i32, i32, i32) {
    %0 = arith.index_cast %arg0 : i32 to index
    %1 = memref.load %arg1[%0] : memref<3xi32, #tpu.memory_space<smem>>
    %c0_i32 = arith.constant 0 : i32
    %c0_i32_0 = arith.constant 0 : i32
    %c0_i32_1 = arith.constant 0 : i32
    return %1, %c0_i32, %c0_i32_0 : i32, i32, i32
  }
  func.func @transform_2(%arg0: i32, %arg1: memref<3xi32, #tpu.memory_space<smem>>) -> (i32, i32, i32) {
    %0 = arith.index_cast %arg0 : i32 to index
    %1 = memref.load %arg1[%0] : memref<3xi32, #tpu.memory_space<smem>>
    %c0_i32 = arith.constant 0 : i32
    %c0_i32_0 = arith.constant 0 : i32
    %c0_i32_1 = arith.constant 0 : i32
    return %1, %c0_i32, %c0_i32_0 : i32, i32, i32
  }
  func.func @transform_3(%arg0: i32, %arg1: memref<3xi32, #tpu.memory_space<smem>>) -> (i32, i32) {
    %c0_i32 = arith.constant 0 : i32
    %c0_i32_0 = arith.constant 0 : i32
    return %arg0, %c0_i32 : i32, i32
  }
}

</mosaic_0001>

<bundles_post_ra>
// kernel: tpu_custom_call.1
= control target key start
LH: loop header
LB: loop body
LE: loop exit
PB: predicated region body
PF: predicated region fallthrough
CT: control target
= control target key end

     0   :  { %s677_s0 = inlined_call_operand.vmem [shape: s32[3], index: 0, kind: input, shape index: {}]   ;;  %s678_s1 = inlined_call_operand.vmem [shape: f32[48,16], index: 1, kind: input, shape index: {}]   ;;  %s679_s2 = inlined_call_operand.vmem [shape: f32[3,16,128], index: 2, kind: input, shape index: {}]   ;;  %s680_s3 = inlined_call_operand.vmem [shape: f32[3,1,128], index: 3, kind: input, shape index: {}]   ;;  %s681_s4 = inlined_call_operand.hbm [shape: f32[48,128], index: 4, kind: output, shape index: {}]  }
   0x1   :  { %s9_s17 = sshll.u32 %s677_s0, 4  ;;  %s10_s17 = int_to_ptr.vmem [resolvable:$true] %s9_s17 }
   0x2   :  { %s455_s18 = scalar_lea.vmem %s10_s17, 16  ;;  %p460_p1 = scmp.lt.s32.totalorder %s10_s17, %s10_s17 }
   0x3   :  { %p456_p0 = scmp.ne.s32.totalorder %s10_s17, %s455_s18  ;;  %p461_p2 = scmp.lt.s32.totalorder %s455_s18, %s455_s18 }
   0x5   :  { %p462_p3 = por %p461_p2, %p460_p1 }
   0x7   :  { %p463_p4 = pnand %p462_p3, %p456_p0 }
   0x9   :  { %466 = shalt.err (!%p463_p4)  }
   0xa   :  { %s533_s19 = smov [#allocation3]  }
   0xb   :  { %12 = dma.vmem_to_smem %s10_s17, 16, %s533_s19, [#allocation2] }
   0xc   :  { %511 = dma.done.wait [#allocation2], 16 }
   0xd   :  { %512 = vsyncadd [#allocation2], 4294967280 }
   0xe   :  { %14 = sfence }
   0xf   :  { %15 = vsyncpa [#allocation5], 0 }
  0x10   :  { %17 = vsyncpa [#allocation5 + $0x1], 0  ;;  %s567_s20 = smov 0   ;;  %s569_s21 = smov 0  }
  0x11   :  { %s571_s0 = smov 0   ;;  %s573_s22 = smov 0  }
  0x12 LB: > { %s588_s23 = sadd.s32 4294967295, %s531_s22   ;;  %s385_s24 = sadd.s32 4294967294, %s531_s22   ;;  %s531_s22 = sphi %s573_s22, %s687_s22   ;;  %s527_s0 = sphi %s571_s0, %s686_s0   ;;  %s523_s21 = sphi %s569_s21, %s685_s21   ;;  %s519_s20 = sphi %s567_s20, %s684_s20  }
  0x13   : > { %s592_s25 = sadd.s32 1, %s531_s22   ;;  %s112_s26 = sadd.s32 1, %s527_s0 }
  0x14   : > { %s109_s27 = ssub.s32 %s531_s22, %s592_s25  ;;  %p122_p5 = scmp.ne.s32.totalorder %s527_s0, %s523_s21 }
  0x15   : > { %p110_p6 = scmp.eq.s32.totalorder %s109_s27, 0  ;;  %p123_p7 = scmp.eq.s32.totalorder %s588_s23, 2 }
  0x16   : > { %p128_p8 = scmp.ne.s32.totalorder %s523_s21, %s519_s20  ;;  %p129_p9 = scmp.eq.s32.totalorder %s385_s24, 2 }
  0x17   : > { %s603_s28 = scalar_select %p110_p6, %s527_s0, %s112_s26  }
  0x18   : > { %p605_p10 = por %p123_p7, %p122_p5  ;;  %p609_p11 = por %p129_p9, %p128_p8 }
  0x19   : > { %p388_p12 = scmp.ge.s32.totalorder %s531_s22, 1  ;;  %p174_p13 = scmp.lt.s32.totalorder %s531_s22, 4 }
  0x1b   : > { %p175_p0 = pnand %p388_p12, %p174_p13 }
  0x1c   : > { %s214_s5 = sld [smem:[#allocation3 + %s588_s23]] (!%p175_p0)  ;;  %s390_s6 = sshll.u32 (!%p175_p0), %s588_s23, 1  ;;  %v534_v0 = vmov (!%p175_p0), 0.0   ;;  %vm535_vm0 = vmmov (!%p175_p0), 0   ;;  %vm241_vm1 = vcmask (!%p175_p0), 130048  }
  0x1d   : > { %178 = sbr.rel (%p175_p0) target bundleno = 277 (0x115), region = 32  ;;  %405 = vmatprep.subr.bf16.mxu0 (!%p175_p0), %v534_v0  ;;  %407 = vmatprep.mubr.msk.bf16.mxu0 (!%p175_p0), %vm535_vm0, %v534_v0  ;;  %p209_p1 = scmp.lt.s32.totalorder (!%p175_p0), %s390_s6, 5 }
  0x1e   : > { %s221_s15 = sld [smem:[#allocation3 + %s588_s23]] (!%p175_p0)  ;;  %s205_s16 = sand.u32 (!%p175_p0), 1, %s523_s21  }
  0x1f   : > { %s389_s17 = sshll.u32 (!%p175_p0), %s205_s16, 4  ;;  %s636_s9 = scalar_lea.sflag (!%p175_p0), [#allocation5], %s205_s16 }
  0x20   : > { %s207_s26 = scalar_lea.vmem (!%p175_p0), [#allocation4], %s389_s17 }
  0x21   : > { %s302_s27 = sshll.u32 (!%p175_p0), %s207_s26, 4  ;;  %s629_s27 = int_to_ptr.vmem [resolvable:$true] %s302_s27 }
  0x22   : > { %p215_p2 = scmp.lt.s32.totalorder (!%p175_p0), %s214_s5, 2 }
  0x24   : > { %s689_s6 = smov (!%p209_p1, %s390_s6), 5  ;;  %s691_s5 = smov (!%p215_p2, %s214_s5), 2 }
  0x25   : > { %s391_s7 = sshll.u32 %s689_s6, 3  ;;  %s401_s11 = sshll.u32 %s691_s5, 4 }
  0x26   : > { %s212_s10 = scalar_lea.vmem %s678_s1, %s391_s7  ;;  %s219_s14 = scalar_lea.vmem %s679_s2, %s401_s11 }
  0x27   : > { %v228_v1 = vld [vmem:[%s212_s10] sm:$0xff]  ;;  %v229_v2 = vld [vmem:[%s212_s10 + $0x8] sm:$0xff]  ;;  %p222_p3 = scmp.lt.s32.totalorder %s221_s15, 2  ;;  %s402_s5 = sshll.u32 %s588_s23, 8 }
  0x28   : > { %v231_v3 = vld [vmem:[%s219_s14] sm:$0xff]  ;;  %v232_v4 = vld [vmem:[%s219_s14 + $0x8] sm:$0xff]  ;;  %v230_v6 = vpack.c.bf16 %v229_v2, %v228_v1  ;;  %s634_s8 = scalar_lea.hbm %s681_s4, %s402_s5  ;;  %s467_s23 = scalar_lea.vmem %s629_s27, 256 }
  0x29   : > { %v233_v5 = vpack.c.bf16 %v232_v4, %v231_v3  ;;  %s693_s15 = smov (!%p222_p3, %s221_s15), 2  ;;  %p468_p4 = scmp.ne.s32.totalorder %s629_s27, %s467_s23 }
  0x2a   : > { %s224_s24 = scalar_lea.vmem %s680_s3, %s693_s15  ;;  %s536_s10 = smov [#allocation4]  }
  0x2b   : > { %406 = vmatpush3.bf16.msra.mxu0 %v233_v5  ;;  %v394_v7 = vld [vmem:[%s224_s24] ss:$0 sm:$0xff]  ;;  %p469_p5 = pnand %p468_p4, %p605_p10  ;;  %s471_s11 = sshll.u32 %s536_s10, 4  ;;  %s472_s11 = int_to_ptr.vmem [resolvable:$false] %s471_s11 }
  0x2c   : > { %s473_s12 = scalar_lea.vmem %s472_s11, 512  ;;  %p474_p7 = scmp.lt.s32.totalorder %s629_s27, %s472_s11 }
  0x2d   : > { %p470_p6 = pneg %p469_p5  ;;  %p475_p8 = scmp.lt.s32.totalorder %s473_s12, %s467_s23 }
  0x2e   : > { %408 = vmatmul.mubr.msk.bf16.vlgmr.msra.gmra.mrb[0].mxu0 %vm241_vm1, %v230_v6 }
  0x2f   : > { %p476_p9 = por %p475_p8, %p474_p7 }
  0x31   : > { %p477_p12 = pnand %p476_p9, %p470_p6 }
 0x101   : > { %v279_v8 = vpop.f32.mrb[0].mxu0 }
 0x102   : > { %v280_v9 = vadd.f32 %v394_v7, %v279_v8  ;;  %v409_v10 = vpop.f32.mrb[1].mxu0 }
 0x103   : > { %v282_v11 = vpop.f32.mrb[2].mxu0 }
 0x104   : > { %286 = vst [vmem:[%s207_s26] sm:$0xff] %v280_v9  ;;  %v283_v12 = vadd.f32 %v394_v7, %v282_v11  ;;  %v410_v13 = vpop.f32.mrb[3].mxu0 }
 0x106   : > { %287 = vst [vmem:[%s207_s26 + $0x8] sm:$0xff] %v283_v12 }
 0x107   : > { %480 = shalt.err (!%p477_p12)
}
 0x108   : > { %s481_s13 = scalar_lea.hbm %s634_s8, 256  ;;  %s485_s16 = scalar_lea.hbm %s681_s4, 768 }
 0x109   : > { %p482_p13 = scmp.ne.s32.totalorder %s634_s8, %s481_s13  ;;  %p486_p2 = scmp.lt.u32.totalorder %s634_s8, %s681_s4 }
 0x10a   : > { %p487_p3 = scmp.lt.u32.totalorder %s485_s16, %s481_s13  ;;  %p489_p5 = scmp.lt.u32.totalorder %s481_s13, %s634_s8 }
 0x10b   : > { %p483_p0 = pnand %p482_p13, %p605_p10 }
 0x10c   : > { %p488_p4 = por %p487_p3, %p486_p2 }
 0x10d   : > { %p484_p1 = pneg %p483_p0 }
 0x10e   : > { %p490_p6 = por %p489_p5, %p488_p4 }
 0x110   : > { %p491_p7 = pnand %p490_p6, %p484_p1 }
 0x112   : > { %494 = shalt.err (!%p491_p7)
}
 0x113   : > { %s537_s19 = smov 128   ;;  %s538_s24 = smov 8  }
 0x114   : > { %411 = dma.vmem_to_hbm [thread:$0]  (%p605_p10), %s629_s27, 256, %s634_s8, %s636_s9, %s537_s19, %s537_s19, %s538_s24  }
 0x115 PF: > { %p417_p8 = scmp.ge.s32.totalorder %s531_s22, 2  ;;  %s317_s26 = sand.u32 1, %s519_s20  }
 0x116   : > { %s318_s5 = scalar_lea.sflag [#allocation5], %s317_s26 }
 0x117   : > { %p414_p9 = pnand %p417_p8, %p609_p11 }
 0x119   : > { %514 = dma.done.wait (!%p414_p9), %s318_s5, 256  }
 0x11a   : > { %516 = vsyncadd (!%p414_p9), %s318_s5, 4294967040  ;;  %p20_p12 = scmp.ge.s32.totalorder %s592_s25, 5   ;;  %s684_s20 = smov %s523_s21 }
 0x11b   : > { %s685_s21 = smov %s527_s0  ;;  %s686_s0 = smov %s603_s28 }
 0x11c   : > { %s687_s22 = smov %s592_s25  ;;  %22 = sbr.rel (!%p20_p12) target bundleno = 18 (0x12), region = 73 }
 0x123   :  { %323 = vsyncpa [#allocation5], 1 }
 0x124   :  { %325 = vsyncpa [#allocation5 + $0x1], 1 }

</bundles_post_ra>
